<compile_context>
chip_gen: v6e
topology: v6e:2x2x1
jax: 0.10.0
libtpu: 0.0.40
codegen_flags: <defaults>
</compile_context>

<pallas_src>
import functools
import math

import jax
import jax.numpy as jnp
from jax.experimental import pallas as pl
from jax.experimental.pallas import tpu as pltpu

_INV_LN10 = 0.43429448190325176          # 1 / ln(10)
_DEFAULT_MIN_PALLAS_ELEMENTS = 256 * 1024  # below this, plain jnp is faster


def _hsm_activation_kernel(x_ref, t_ref, o_ref):
    # x_ref: (TM, TN) tile, t_ref: (1, TN) threshold tile, o_ref: (TM, TN)
    # TODO(synk): for bf16 inputs on v6e/v7x a bf16 EUP path would double
    # transcendental throughput; kept f32 here for accuracy / v5e portability.
    z = x_ref[...].astype(jnp.float32) - t_ref[...].astype(jnp.float32)
    sp = jnp.maximum(z, 0.0) + jnp.log1p(jnp.exp(-jnp.abs(z)))  # stable softplus
    o_ref[...] = (sp * _INV_LN10).astype(o_ref.dtype)


def _round_up(v, m):
    return ((v + m - 1) // m) * m


def _default_block_shape():
    """Chip-dependent default tiles (trace-time only)."""
    try:
        kind = jax.devices()[0].device_kind.lower()
    except Exception:  # pragma: no cover - defensive
        kind = ""
    if "v7" in kind:
        # 4 MiB f32 tiles; ~16 MiB double-buffered x+out, fits 32 MiB scoped.
        return 1024, 1024
    return 512, 1024


def _reference(x, thresholds):
    """Stable pure-jnp reference / small-input path."""
    z = x.astype(jnp.float32) - thresholds.astype(jnp.float32)
    sp = jnp.maximum(z, 0.0) + jnp.log1p(jnp.exp(-jnp.abs(z)))
    return (sp * _INV_LN10).astype(x.dtype)


@functools.partial(
    jax.jit, static_argnames=("block_m", "block_n", "min_pallas_elements")
)
def hsm_cortical_activation(
    x,
    thresholds,
    *,
    block_m=None,
    block_n=None,
    min_pallas_elements=_DEFAULT_MIN_PALLAS_ELEMENTS,
):
    """Forward pass of HSMCorticalActivation.

    Args:
      x:          (..., input_size) float32 (or bfloat16)
      thresholds: (1, input_size) float32 parameter
    Returns:
      Same shape/dtype as x: log10(1 + exp(x - thresholds))
    """
    orig_shape = x.shape
    n = thresholds.shape[-1]
    x2 = x.reshape(-1, n)
    m = x2.shape[0]
    t2 = thresholds.reshape(1, n)

    # ---- small-input bypass: custom-call launch + per-step overhead would
    # dominate, let XLA's fused elementwise path handle it.
    if m * n < min_pallas_elements:
        return _reference(x2, t2).reshape(orig_shape)

    if block_m is None or block_n is None:
        dbm, dbn = _default_block_shape()
        block_m = block_m if block_m is not None else dbm
        block_n = block_n if block_n is not None else dbn

    # ---- lane-dense repack for narrow / unaligned feature dims:
    # thresholds tiled to width L = lcm(n, 128); x reshaped to (m*n/L, L).
    # Row-major reshape preserves flat order, and L % n == 0 keeps the
    # threshold pattern aligned, so this is exactly elementwise-equivalent.
    if n % 128 != 0:
        L = math.lcm(n, 128)
        if L <= block_n and (m * n) % L == 0:
            t2 = jnp.tile(t2, (1, L // n))
            x2 = x2.reshape((m * n) // L, L)
            m, n = x2.shape

    sub = 16 if x2.dtype == jnp.bfloat16 else 8
    tm = min(block_m, _round_up(m, sub))
    tn = min(block_n, _round_up(n, 128))  # always 128-multiple => always legal

    # Features OUTER, rows INNER: threshold block index constant over the
    # inner loop (single fetch per feature tile).
    grid = (pl.cdiv(n, tn), pl.cdiv(m, tm))

    x_itemsize = jnp.dtype(x2.dtype).itemsize
    t_itemsize = jnp.dtype(t2.dtype).itemsize
    cost = pl.CostEstimate(
        flops=4 * m * n,                              # sub, max, add, scale
        transcendentals=2 * m * n,                    # exp + log1p
        bytes_accessed=2 * m * n * x_itemsize + n * t_itemsize,
    )

    out = pl.pallas_call(
        _hsm_activation_kernel,
        out_shape=jax.ShapeDtypeStruct((m, n), x2.dtype),
        grid_spec=pltpu.PrefetchScalarGridSpec(
            num_scalar_prefetch=0,
            grid=grid,
            in_specs=[
                pl.BlockSpec((tm, tn), lambda j, i: (i, j)),
                pl.BlockSpec((1, tn), lambda j, i: (0, j)),
            ],
            out_specs=pl.BlockSpec((tm, tn), lambda j, i: (i, j)),
        ),
        compiler_params=pltpu.CompilerParams(
            dimension_semantics=("parallel", "parallel"),
            vmem_limit_bytes=32 << 20,  # above v5e's 16 MiB scoped default
        ),
        cost_estimate=cost,
    )(x2, t2)

    return out.reshape(orig_shape)


if __name__ == "__main__":
    key = jax.random.PRNGKey(0)
    k_x, k_t = jax.random.split(key)

    batch = 16
    input_size = 32

    x = jax.random.normal(k_x, (batch, input_size), jnp.float32)
    # torch.empty(...).uniform_() default range is U(0, 1)
    thresholds = jax.random.uniform(k_t, (1, input_size), jnp.float32)

    # Force the Pallas path (the default small-input bypass would otherwise
    # route this tiny layer to plain jnp).
    out = hsm_cortical_activation(x, thresholds, min_pallas_elements=0)
    out = jax.block_until_ready(out)

    ref = _reference(x, thresholds)
    assert out.shape == (batch, input_size)
    assert jnp.allclose(out, ref, atol=1e-5, rtol=1e-5)

    # Default (bypass) path must agree as well.
    out2 = jax.block_until_ready(hsm_cortical_activation(x, thresholds))
    assert jnp.allclose(out2, ref, atol=1e-5, rtol=1e-5)

    print("KERNEL_OK")
</pallas_src>

<mosaic_0001>
module attributes {stable_mosaic.version = 11 : i64} {
  func.func @_hsm_activation_kernel(%arg0: i32, %arg1: i32, %arg2: memref<8x128xf32, #tpu.memory_space<vmem>>, %arg3: memref<1x128xf32, #tpu.memory_space<vmem>>, %arg4: memref<8x128xf32, #tpu.memory_space<vmem>>) attributes {dimension_semantics = [#tpu.dimension_semantics<parallel>, #tpu.dimension_semantics<parallel>], iteration_bounds = array<i64: 1, 1>, scalar_prefetch = 0 : i64, scratch_operands = 0 : i64, tpu.core_type = #tpu.core_type<tc>, window_params = [{transform_indices = @transform_0, window_bounds = array<i64: 8, 128>}, {transform_indices = @transform_1, window_bounds = array<i64: 1, 128>}, {transform_indices = @transform_2, window_bounds = array<i64: 8, 128>}]} {
    %c0 = arith.constant 0 : index
    %c0_0 = arith.constant 0 : index
    %0 = vector.load %arg2[%c0, %c0_0] : memref<8x128xf32, #tpu.memory_space<vmem>>, vector<8x128xf32>
    %c0_1 = arith.constant 0 : index
    %c0_2 = arith.constant 0 : index
    %1 = vector.load %arg3[%c0_1, %c0_2] : memref<1x128xf32, #tpu.memory_space<vmem>>, vector<1x128xf32>
    %2 = vector.broadcast %1 : vector<1x128xf32> to vector<8x128xf32>
    %3 = arith.subf %0, %2 : vector<8x128xf32>
    %cst = arith.constant 0.000000e+00 : f32
    %4 = vector.broadcast %cst : f32 to vector<8x128xf32>
    %5 = arith.maximumf %3, %4 : vector<8x128xf32>
    %6 = math.absf %3 : vector<8x128xf32>
    %cst_3 = arith.constant 0.000000e+00 : f32
    %7 = vector.broadcast %cst_3 : f32 to vector<8x128xf32>
    %8 = arith.subf %7, %6 : vector<8x128xf32>
    %9 = math.exp %8 : vector<8x128xf32>
    %10 = math.log1p %9 : vector<8x128xf32>
    %11 = arith.addf %5, %10 : vector<8x128xf32>
    %cst_4 = arith.constant 0.434294492 : f32
    %12 = vector.broadcast %cst_4 : f32 to vector<8x128xf32>
    %13 = arith.mulf %11, %12 : vector<8x128xf32>
    %c0_5 = arith.constant 0 : index
    %c0_6 = arith.constant 0 : index
    %14 = vector.load %arg4[%c0_5, %c0_6] : memref<8x128xf32, #tpu.memory_space<vmem>>, vector<8x128xf32>
    tpu.vector_store %arg4[%c0_5, %c0_6], %13 {strides = array<i32>} : memref<8x128xf32, #tpu.memory_space<vmem>>, vector<8x128xf32>,
    return
  }
  func.func @transform_0(%arg0: i32, %arg1: i32) -> (i32, i32) {
    %c0_i32 = arith.constant 0 : i32
    return %arg1, %arg0 : i32, i32
  }
  func.func @transform_1(%arg0: i32, %arg1: i32) -> (i32, i32) {
    %c0_i32 = arith.constant 0 : i32
    %c0_i32_0 = arith.constant 0 : i32
    return %c0_i32, %arg0 : i32, i32
  }
  func.func @transform_2(%arg0: i32, %arg1: i32) -> (i32, i32) {
    %c0_i32 = arith.constant 0 : i32
    return %arg1, %arg0 : i32, i32
  }
}

</mosaic_0001>

<bundles_post_ra>
// kernel: hsm_cortical_activation.1
= control target key start
LH: loop header
LB: loop body
LE: loop exit
PB: predicated region body
PF: predicated region fallthrough
CT: control target
= control target key end

     0   :  { %s107_s0 = inlined_call_operand.vmem [shape: f32[4,128], index: 0, kind: input, shape index: {}]   ;;  %s108_s1 = inlined_call_operand.vmem [shape: f32[1,128], index: 1, kind: input, shape index: {}]   ;;  %s109_s2 = inlined_call_operand.vmem [shape: f32[4,128], index: 2, kind: output, shape index: {}]  }
   0x1   :  { %v11_v0 = vld [vmem:[%s107_s0] sm:$0xff] }
   0x2   :  { %v78_v1 = vld [vmem:[%s108_s1] ss:$0 sm:$0xff] }
   0x3   :  { %v19_v2 = vsub.f32 %v11_v0, %v78_v1 }
   0x5   :  { %v21_v3 = vand.u32 2147483647, %v19_v2  ;;  %v20_v13 = vmax.f32 %v19_v2, 0.0 }
   0x7   :  { %v22_v4 = vsub.f32 0.0, %v21_v3 }
   0x9   :  { %v23_v5 = vmul.f32 1.442695, %v22_v4 }
   0xb   :  { %79 = vpow2.f32 %v23_v5 }
  0x18   :  { %v80_v6 = vpop.eup %79 }
  0x19   :  { %v25_v7 = vadd.f32 1.0, %v80_v6  ;;  %v28_v8 = vmul.f32 -0.5, %v80_v6  ;;  %v31_v10 = vand.u32 2147483647, %v80_v6 }
  0x1b   :  { %81 = vlog2.f32 %v25_v7  ;;  %v29_v9 = vadd.f32 1.0, %v28_v8  ;;  %vm32_vm0 = vcmp.lt.f32.partialorder %v31_v10, 0.0004427343 }
  0x1d   :  { %v30_v11 = vmul.f32 %v80_v6, %v29_v9 }
  0x28   :  { %v82_v12 = vpop.eup %81 }
  0x29   :  { %v27_v14 = vmul.f32 0.6931472, %v82_v12 }
  0x2b   :  { %v33_v15 = vsel %vm32_vm0, %v30_v11, %v27_v14 }
  0x2c   :  { %v34_v16 = vadd.f32 %v33_v15, %v20_v13 }
  0x2e   :  { %v35_v17 = vmul.f32 0.4342945, %v34_v16 }
  0x30   :  { %36 = vst [vmem:[#allocation2] sm:$0xff] %v35_v17 }
  0x37   :  { %v55_v18 = vld [vmem:[#allocation2] sm:$0xf] }
  0x38   :  { %56 = vst [vmem:[%s109_s2] sm:$0xf] %v55_v18 }

</bundles_post_ra>
